<compile_context>
chip_gen: v7x
topology: tpu7x:2x2x1
jax: 0.10.0
libtpu: 0.0.40
codegen_flags: <defaults>
</compile_context>

<pallas_src>
import jax
import jax.numpy as jnp
from jax.experimental import pallas as pl
from jax.experimental.pallas import tpu as pltpu


def _linear_vpu(w, b, x):
    """y = w @ x + b on the VPU.  w: (out, in), b: (out, 1), x: (in, N) -> (out, N).

    K is tiny (2 or 10), so unroll it in Python: each step is one broadcast
    multiply-add over full (out, N) vregs — no MXU push/pop latency.
    """
    out_dim, in_dim = w.shape
    acc = w[:, 0:1] * x[0:1, :]
    for k in range(1, in_dim):
        acc = acc + w[:, k:k + 1] * x[k:k + 1, :]
    return acc + b


def mlp_kernel(x_ref, w1_ref, b1_ref, w2_ref, b2_ref, w3_ref, b3_ref, o_ref):
    x = x_ref[...]                                        # (2, BN)  batch on lanes
    h1 = jnp.maximum(_linear_vpu(w1_ref[...], b1_ref[...], x), 0.0)    # (10, BN)
    h2 = jnp.maximum(_linear_vpu(w2_ref[...], b2_ref[...], h1), 0.0)   # (10, BN)
    z = _linear_vpu(w3_ref[...], b3_ref[...], h2)                      # (1, BN)
    # Numerically-stable sigmoid: exp on EUP, no overflow for large |z|.
    e = jnp.exp(-jnp.abs(z))
    inv = 1.0 / (1.0 + e)
    o_ref[...] = jnp.where(z >= 0.0, inv, e * inv).astype(o_ref.dtype)


def simple_nn_forward(x, params, block_n=1024):
    """x: (N, 2) float32 (PyTorch layout).  params: PyTorch-layout weights/biases.

    Returns (N, 1) float32, matching nn.Sequential(Linear, ReLU, ..., Sigmoid)(x).
    """
    n, in_features = x.shape
    w1, b1 = params["w1"], params["b1"].reshape(-1, 1)   # (10, 2), (10, 1)
    w2, b2 = params["w2"], params["b2"].reshape(-1, 1)   # (10, 10), (10, 1)
    w3, b3 = params["w3"], params["b3"].reshape(-1, 1)   # (1, 10),  (1, 1)

    # Lane-dense: batch on the 128-lane axis. Pad batch to a multiple of the block.
    block_n = max(128, min(block_n, pl.cdiv(n, 128) * 128))
    n_pad = pl.cdiv(n, block_n) * block_n
    xt = jnp.pad(x.T, ((0, 0), (0, n_pad - n)))          # (2, n_pad)
    grid = (n_pad // block_n,)

    full = lambda a: pl.BlockSpec(a.shape, lambda i: (0,) * a.ndim)  # resident weights

    cost = pl.CostEstimate(
        flops=2 * n_pad * (2 * 10 + 10 * 10 + 10 * 1),
        transcendentals=n_pad,
        bytes_accessed=4 * (xt.size + n_pad)
        + sum(4 * a.size for a in (w1, b1, w2, b2, w3, b3)),
    )

    out_t = pl.pallas_call(
        mlp_kernel,
        out_shape=jax.ShapeDtypeStruct((1, n_pad), jnp.float32),
        grid=grid,
        in_specs=[
            pl.BlockSpec((in_features, block_n), lambda i: (0, i)),   # streamed x
            full(w1), full(b1), full(w2), full(b2), full(w3), full(b3),
        ],
        out_specs=pl.BlockSpec((1, block_n), lambda i: (0, i)),       # lane-dense out
        compiler_params=pltpu.CompilerParams(
            dimension_semantics=("parallel",),            # 2-TC sharding on v7x
        ),
        cost_estimate=cost,
    )(xt, w1, b1, w2, b2, w3, b3)

    return out_t[:, :n].T                                 # back to PyTorch (N, 1)


def init_params(key):
    """PyTorch-default init: U(-1/sqrt(fan_in), 1/sqrt(fan_in)), (out, in) weights."""
    ks = jax.random.split(key, 6)

    def linear(kw, kb, fan_in, fan_out):
        bound = 1.0 / (fan_in ** 0.5)
        w = jax.random.uniform(kw, (fan_out, fan_in), jnp.float32, -bound, bound)
        b = jax.random.uniform(kb, (fan_out,), jnp.float32, -bound, bound)
        return w, b

    w1, b1 = linear(ks[0], ks[1], 2, 10)
    w2, b2 = linear(ks[2], ks[3], 10, 10)
    w3, b3 = linear(ks[4], ks[5], 10, 1)
    return {"w1": w1, "b1": b1, "w2": w2, "b2": b2, "w3": w3, "b3": b3}


if __name__ == "__main__":
    key = jax.random.PRNGKey(0)
    k_params, k_x = jax.random.split(key)

    params = init_params(k_params)
    # Batch not a multiple of 128 on purpose: exercises padding + multi-step grid.
    n = 300
    x = jax.random.normal(k_x, (n, 2), dtype=jnp.float32)

    out = simple_nn_forward(x, params, block_n=128)       # grid = (3,)
    jax.block_until_ready(out)

    # Plain-JAX reference (PyTorch semantics: y = x @ W^T + b).
    h1 = jnp.maximum(x @ params["w1"].T + params["b1"], 0.0)
    h2 = jnp.maximum(h1 @ params["w2"].T + params["b2"], 0.0)
    ref = jax.nn.sigmoid(h2 @ params["w3"].T + params["b3"])

    assert out.shape == (n, 1), out.shape
    assert jnp.allclose(out, ref, atol=1e-5, rtol=1e-5), "mismatch vs reference"

    print("KERNEL_OK")
</pallas_src>

<mosaic_0001>
module attributes {stable_mosaic.version = 11 : i64} {
  func.func @mlp_kernel(%arg0: i32, %arg1: memref<2x128xf32, #tpu.memory_space<vmem>>, %arg2: memref<10x2xf32, #tpu.memory_space<vmem>>, %arg3: memref<10x1xf32, #tpu.memory_space<vmem>>, %arg4: memref<10x10xf32, #tpu.memory_space<vmem>>, %arg5: memref<10x1xf32, #tpu.memory_space<vmem>>, %arg6: memref<1x10xf32, #tpu.memory_space<vmem>>, %arg7: memref<1x1xf32, #tpu.memory_space<vmem>>, %arg8: memref<1x128xf32, #tpu.memory_space<vmem>>) attributes {dimension_semantics = [#tpu.dimension_semantics<parallel>], iteration_bounds = array<i64: 3>, scalar_prefetch = 0 : i64, scratch_operands = 0 : i64, tpu.core_type = #tpu.core_type<tc>, window_params = [{transform_indices = @transform_0, window_bounds = array<i64: 2, 128>}, {pipeline_mode = #tpu.pipeline_mode<synchronous>, transform_indices = @transform_1, window_bounds = array<i64: 10, 2>}, {pipeline_mode = #tpu.pipeline_mode<synchronous>, transform_indices = @transform_2, window_bounds = array<i64: 10, 1>}, {pipeline_mode = #tpu.pipeline_mode<synchronous>, transform_indices = @transform_3, window_bounds = array<i64: 10, 10>}, {pipeline_mode = #tpu.pipeline_mode<synchronous>, transform_indices = @transform_4, window_bounds = array<i64: 10, 1>}, {pipeline_mode = #tpu.pipeline_mode<synchronous>, transform_indices = @transform_5, window_bounds = array<i64: 1, 10>}, {pipeline_mode = #tpu.pipeline_mode<synchronous>, transform_indices = @transform_6, window_bounds = array<i64: 1, 1>}, {transform_indices = @transform_7, window_bounds = array<i64: 1, 128>}]} {
    %c0 = arith.constant 0 : index
    %c0_0 = arith.constant 0 : index
    %0 = vector.load %arg1[%c0, %c0_0] : memref<2x128xf32, #tpu.memory_space<vmem>>, vector<2x128xf32>
    %c0_1 = arith.constant 0 : index
    %c0_2 = arith.constant 0 : index
    %1 = vector.load %arg2[%c0_1, %c0_2] : memref<10x2xf32, #tpu.memory_space<vmem>>, vector<10x2xf32>
    %c0_3 = arith.constant 0 : index
    %c0_4 = arith.constant 0 : index
    %2 = vector.load %arg3[%c0_3, %c0_4] : memref<10x1xf32, #tpu.memory_space<vmem>>, vector<10x1xf32>
    %3 = vector.extract_strided_slice %1 {offsets = [0, 0], sizes = [10, 1], strides = [1, 1]} : vector<10x2xf32> to vector<10x1xf32>
    %4 = vector.extract_strided_slice %0 {offsets = [0, 0], sizes = [1, 128], strides = [1, 1]} : vector<2x128xf32> to vector<1x128xf32>
    %5 = vector.broadcast %3 : vector<10x1xf32> to vector<10x128xf32>
    %6 = vector.broadcast %4 : vector<1x128xf32> to vector<10x128xf32>
    %7 = arith.mulf %5, %6 : vector<10x128xf32>
    %8 = vector.extract_strided_slice %1 {offsets = [0, 1], sizes = [10, 1], strides = [1, 1]} : vector<10x2xf32> to vector<10x1xf32>
    %9 = vector.extract_strided_slice %0 {offsets = [1, 0], sizes = [1, 128], strides = [1, 1]} : vector<2x128xf32> to vector<1x128xf32>
    %10 = vector.broadcast %8 : vector<10x1xf32> to vector<10x128xf32>
    %11 = vector.broadcast %9 : vector<1x128xf32> to vector<10x128xf32>
    %12 = arith.mulf %10, %11 : vector<10x128xf32>
    %13 = arith.addf %7, %12 : vector<10x128xf32>
    %14 = vector.broadcast %2 : vector<10x1xf32> to vector<10x128xf32>
    %15 = arith.addf %13, %14 : vector<10x128xf32>
    %cst = arith.constant 0.000000e+00 : f32
    %16 = vector.broadcast %cst : f32 to vector<10x128xf32>
    %17 = arith.maximumf %15, %16 : vector<10x128xf32>
    %c0_5 = arith.constant 0 : index
    %c0_6 = arith.constant 0 : index
    %18 = vector.load %arg4[%c0_5, %c0_6] : memref<10x10xf32, #tpu.memory_space<vmem>>, vector<10x10xf32>
    %c0_7 = arith.constant 0 : index
    %c0_8 = arith.constant 0 : index
    %19 = vector.load %arg5[%c0_7, %c0_8] : memref<10x1xf32, #tpu.memory_space<vmem>>, vector<10x1xf32>
    %20 = vector.extract_strided_slice %18 {offsets = [0, 0], sizes = [10, 1], strides = [1, 1]} : vector<10x10xf32> to vector<10x1xf32>
    %21 = vector.extract_strided_slice %17 {offsets = [0, 0], sizes = [1, 128], strides = [1, 1]} : vector<10x128xf32> to vector<1x128xf32>
    %22 = vector.broadcast %20 : vector<10x1xf32> to vector<10x128xf32>
    %23 = vector.broadcast %21 : vector<1x128xf32> to vector<10x128xf32>
    %24 = arith.mulf %22, %23 : vector<10x128xf32>
    %25 = vector.extract_strided_slice %18 {offsets = [0, 1], sizes = [10, 1], strides = [1, 1]} : vector<10x10xf32> to vector<10x1xf32>
    %26 = vector.extract_strided_slice %17 {offsets = [1, 0], sizes = [1, 128], strides = [1, 1]} : vector<10x128xf32> to vector<1x128xf32>
    %27 = vector.broadcast %25 : vector<10x1xf32> to vector<10x128xf32>
    %28 = vector.broadcast %26 : vector<1x128xf32> to vector<10x128xf32>
    %29 = arith.mulf %27, %28 : vector<10x128xf32>
    %30 = arith.addf %24, %29 : vector<10x128xf32>
    %31 = vector.extract_strided_slice %18 {offsets = [0, 2], sizes = [10, 1], strides = [1, 1]} : vector<10x10xf32> to vector<10x1xf32>
    %32 = vector.extract_strided_slice %17 {offsets = [2, 0], sizes = [1, 128], strides = [1, 1]} : vector<10x128xf32> to vector<1x128xf32>
    %33 = vector.broadcast %31 : vector<10x1xf32> to vector<10x128xf32>
    %34 = vector.broadcast %32 : vector<1x128xf32> to vector<10x128xf32>
    %35 = arith.mulf %33, %34 : vector<10x128xf32>
    %36 = arith.addf %30, %35 : vector<10x128xf32>
    %37 = vector.extract_strided_slice %18 {offsets = [0, 3], sizes = [10, 1], strides = [1, 1]} : vector<10x10xf32> to vector<10x1xf32>
    %38 = vector.extract_strided_slice %17 {offsets = [3, 0], sizes = [1, 128], strides = [1, 1]} : vector<10x128xf32> to vector<1x128xf32>
    %39 = vector.broadcast %37 : vector<10x1xf32> to vector<10x128xf32>
    %40 = vector.broadcast %38 : vector<1x128xf32> to vector<10x128xf32>
    %41 = arith.mulf %39, %40 : vector<10x128xf32>
    %42 = arith.addf %36, %41 : vector<10x128xf32>
    %43 = vector.extract_strided_slice %18 {offsets = [0, 4], sizes = [10, 1], strides = [1, 1]} : vector<10x10xf32> to vector<10x1xf32>
    %44 = vector.extract_strided_slice %17 {offsets = [4, 0], sizes = [1, 128], strides = [1, 1]} : vector<10x128xf32> to vector<1x128xf32>
    %45 = vector.broadcast %43 : vector<10x1xf32> to vector<10x128xf32>
    %46 = vector.broadcast %44 : vector<1x128xf32> to vector<10x128xf32>
    %47 = arith.mulf %45, %46 : vector<10x128xf32>
    %48 = arith.addf %42, %47 : vector<10x128xf32>
    %49 = vector.extract_strided_slice %18 {offsets = [0, 5], sizes = [10, 1], strides = [1, 1]} : vector<10x10xf32> to vector<10x1xf32>
    %50 = vector.extract_strided_slice %17 {offsets = [5, 0], sizes = [1, 128], strides = [1, 1]} : vector<10x128xf32> to vector<1x128xf32>
    %51 = vector.broadcast %49 : vector<10x1xf32> to vector<10x128xf32>
    %52 = vector.broadcast %50 : vector<1x128xf32> to vector<10x128xf32>
    %53 = arith.mulf %51, %52 : vector<10x128xf32>
    %54 = arith.addf %48, %53 : vector<10x128xf32>
    %55 = vector.extract_strided_slice %18 {offsets = [0, 6], sizes = [10, 1], strides = [1, 1]} : vector<10x10xf32> to vector<10x1xf32>
    %56 = vector.extract_strided_slice %17 {offsets = [6, 0], sizes = [1, 128], strides = [1, 1]} : vector<10x128xf32> to vector<1x128xf32>
    %57 = vector.broadcast %55 : vector<10x1xf32> to vector<10x128xf32>
    %58 = vector.broadcast %56 : vector<1x128xf32> to vector<10x128xf32>
    %59 = arith.mulf %57, %58 : vector<10x128xf32>
    %60 = arith.addf %54, %59 : vector<10x128xf32>
    %61 = vector.extract_strided_slice %18 {offsets = [0, 7], sizes = [10, 1], strides = [1, 1]} : vector<10x10xf32> to vector<10x1xf32>
    %62 = vector.extract_strided_slice %17 {offsets = [7, 0], sizes = [1, 128], strides = [1, 1]} : vector<10x128xf32> to vector<1x128xf32>
    %63 = vector.broadcast %61 : vector<10x1xf32> to vector<10x128xf32>
    %64 = vector.broadcast %62 : vector<1x128xf32> to vector<10x128xf32>
    %65 = arith.mulf %63, %64 : vector<10x128xf32>
    %66 = arith.addf %60, %65 : vector<10x128xf32>
    %67 = vector.extract_strided_slice %18 {offsets = [0, 8], sizes = [10, 1], strides = [1, 1]} : vector<10x10xf32> to vector<10x1xf32>
    %68 = vector.extract_strided_slice %17 {offsets = [8, 0], sizes = [1, 128], strides = [1, 1]} : vector<10x128xf32> to vector<1x128xf32>
    %69 = vector.broadcast %67 : vector<10x1xf32> to vector<10x128xf32>
    %70 = vector.broadcast %68 : vector<1x128xf32> to vector<10x128xf32>
    %71 = arith.mulf %69, %70 : vector<10x128xf32>
    %72 = arith.addf %66, %71 : vector<10x128xf32>
    %73 = vector.extract_strided_slice %18 {offsets = [0, 9], sizes = [10, 1], strides = [1, 1]} : vector<10x10xf32> to vector<10x1xf32>
    %74 = vector.extract_strided_slice %17 {offsets = [9, 0], sizes = [1, 128], strides = [1, 1]} : vector<10x128xf32> to vector<1x128xf32>
    %75 = vector.broadcast %73 : vector<10x1xf32> to vector<10x128xf32>
    %76 = vector.broadcast %74 : vector<1x128xf32> to vector<10x128xf32>
    %77 = arith.mulf %75, %76 : vector<10x128xf32>
    %78 = arith.addf %72, %77 : vector<10x128xf32>
    %79 = vector.broadcast %19 : vector<10x1xf32> to vector<10x128xf32>
    %80 = arith.addf %78, %79 : vector<10x128xf32>
    %cst_9 = arith.constant 0.000000e+00 : f32
    %81 = vector.broadcast %cst_9 : f32 to vector<10x128xf32>
    %82 = arith.maximumf %80, %81 : vector<10x128xf32>
    %c0_10 = arith.constant 0 : index
    %c0_11 = arith.constant 0 : index
    %83 = vector.load %arg6[%c0_10, %c0_11] : memref<1x10xf32, #tpu.memory_space<vmem>>, vector<1x10xf32>
    %c0_12 = arith.constant 0 : index
    %c0_13 = arith.constant 0 : index
    %84 = vector.load %arg7[%c0_12, %c0_13] : memref<1x1xf32, #tpu.memory_space<vmem>>, vector<1x1xf32>
    %85 = vector.extract_strided_slice %83 {offsets = [0, 0], sizes = [1, 1], strides = [1, 1]} : vector<1x10xf32> to vector<1x1xf32>
    %86 = vector.extract_strided_slice %82 {offsets = [0, 0], sizes = [1, 128], strides = [1, 1]} : vector<10x128xf32> to vector<1x128xf32>
    %87 = vector.broadcast %85 : vector<1x1xf32> to vector<1x128xf32>
    %88 = arith.mulf %87, %86 : vector<1x128xf32>
    %89 = vector.extract_strided_slice %83 {offsets = [0, 1], sizes = [1, 1], strides = [1, 1]} : vector<1x10xf32> to vector<1x1xf32>
    %90 = vector.extract_strided_slice %82 {offsets = [1, 0], sizes = [1, 128], strides = [1, 1]} : vector<10x128xf32> to vector<1x128xf32>
    %91 = vector.broadcast %89 : vector<1x1xf32> to vector<1x128xf32>
    %92 = arith.mulf %91, %90 : vector<1x128xf32>
    %93 = arith.addf %88, %92 : vector<1x128xf32>
    %94 = vector.extract_strided_slice %83 {offsets = [0, 2], sizes = [1, 1], strides = [1, 1]} : vector<1x10xf32> to vector<1x1xf32>
    %95 = vector.extract_strided_slice %82 {offsets = [2, 0], sizes = [1, 128], strides = [1, 1]} : vector<10x128xf32> to vector<1x128xf32>
    %96 = vector.broadcast %94 : vector<1x1xf32> to vector<1x128xf32>
    %97 = arith.mulf %96, %95 : vector<1x128xf32>
    %98 = arith.addf %93, %97 : vector<1x128xf32>
    %99 = vector.extract_strided_slice %83 {offsets = [0, 3], sizes = [1, 1], strides = [1, 1]} : vector<1x10xf32> to vector<1x1xf32>
    %100 = vector.extract_strided_slice %82 {offsets = [3, 0], sizes = [1, 128], strides = [1, 1]} : vector<10x128xf32> to vector<1x128xf32>
    %101 = vector.broadcast %99 : vector<1x1xf32> to vector<1x128xf32>
    %102 = arith.mulf %101, %100 : vector<1x128xf32>
    %103 = arith.addf %98, %102 : vector<1x128xf32>
    %104 = vector.extract_strided_slice %83 {offsets = [0, 4], sizes = [1, 1], strides = [1, 1]} : vector<1x10xf32> to vector<1x1xf32>
    %105 = vector.extract_strided_slice %82 {offsets = [4, 0], sizes = [1, 128], strides = [1, 1]} : vector<10x128xf32> to vector<1x128xf32>
    %106 = vector.broadcast %104 : vector<1x1xf32> to vector<1x128xf32>
    %107 = arith.mulf %106, %105 : vector<1x128xf32>
    %108 = arith.addf %103, %107 : vector<1x128xf32>
    %109 = vector.extract_strided_slice %83 {offsets = [0, 5], sizes = [1, 1], strides = [1, 1]} : vector<1x10xf32> to vector<1x1xf32>
    %110 = vector.extract_strided_slice %82 {offsets = [5, 0], sizes = [1, 128], strides = [1, 1]} : vector<10x128xf32> to vector<1x128xf32>
    %111 = vector.broadcast %109 : vector<1x1xf32> to vector<1x128xf32>
    %112 = arith.mulf %111, %110 : vector<1x128xf32>
    %113 = arith.addf %108, %112 : vector<1x128xf32>
    %114 = vector.extract_strided_slice %83 {offsets = [0, 6], sizes = [1, 1], strides = [1, 1]} : vector<1x10xf32> to vector<1x1xf32>
    %115 = vector.extract_strided_slice %82 {offsets = [6, 0], sizes = [1, 128], strides = [1, 1]} : vector<10x128xf32> to vector<1x128xf32>
    %116 = vector.broadcast %114 : vector<1x1xf32> to vector<1x128xf32>
    %117 = arith.mulf %116, %115 : vector<1x128xf32>
    %118 = arith.addf %113, %117 : vector<1x128xf32>
    %119 = vector.extract_strided_slice %83 {offsets = [0, 7], sizes = [1, 1], strides = [1, 1]} : vector<1x10xf32> to vector<1x1xf32>
    %120 = vector.extract_strided_slice %82 {offsets = [7, 0], sizes = [1, 128], strides = [1, 1]} : vector<10x128xf32> to vector<1x128xf32>
    %121 = vector.broadcast %119 : vector<1x1xf32> to vector<1x128xf32>
    %122 = arith.mulf %121, %120 : vector<1x128xf32>
    %123 = arith.addf %118, %122 : vector<1x128xf32>
    %124 = vector.extract_strided_slice %83 {offsets = [0, 8], sizes = [1, 1], strides = [1, 1]} : vector<1x10xf32> to vector<1x1xf32>
    %125 = vector.extract_strided_slice %82 {offsets = [8, 0], sizes = [1, 128], strides = [1, 1]} : vector<10x128xf32> to vector<1x128xf32>
    %126 = vector.broadcast %124 : vector<1x1xf32> to vector<1x128xf32>
    %127 = arith.mulf %126, %125 : vector<1x128xf32>
    %128 = arith.addf %123, %127 : vector<1x128xf32>
    %129 = vector.extract_strided_slice %83 {offsets = [0, 9], sizes = [1, 1], strides = [1, 1]} : vector<1x10xf32> to vector<1x1xf32>
    %130 = vector.extract_strided_slice %82 {offsets = [9, 0], sizes = [1, 128], strides = [1, 1]} : vector<10x128xf32> to vector<1x128xf32>
    %131 = vector.broadcast %129 : vector<1x1xf32> to vector<1x128xf32>
    %132 = arith.mulf %131, %130 : vector<1x128xf32>
    %133 = arith.addf %128, %132 : vector<1x128xf32>
    %134 = vector.broadcast %84 : vector<1x1xf32> to vector<1x128xf32>
    %135 = arith.addf %133, %134 : vector<1x128xf32>
    %136 = math.absf %135 : vector<1x128xf32>
    %cst_14 = arith.constant 0.000000e+00 : f32
    %137 = vector.broadcast %cst_14 : f32 to vector<1x128xf32>
    %138 = arith.subf %137, %136 : vector<1x128xf32>
    %139 = math.exp %138 : vector<1x128xf32>
    %cst_15 = arith.constant 1.000000e+00 : f32
    %140 = vector.broadcast %cst_15 : f32 to vector<1x128xf32>
    %141 = arith.addf %140, %139 : vector<1x128xf32>
    %cst_16 = arith.constant 1.000000e+00 : f32
    %142 = vector.broadcast %cst_16 : f32 to vector<1x128xf32>
    %143 = arith.divf %142, %141 : vector<1x128xf32>
    %cst_17 = arith.constant 0.000000e+00 : f32
    %144 = vector.broadcast %cst_17 : f32 to vector<1x128xf32>
    %145 = arith.cmpf oge, %135, %144 : vector<1x128xf32>
    %146 = arith.mulf %139, %143 : vector<1x128xf32>
    %147 = arith.select %145, %143, %146 : vector<1x128xi1>, vector<1x128xf32>
    %c0_18 = arith.constant 0 : index
    %c0_19 = arith.constant 0 : index
    %148 = vector.load %arg8[%c0_18, %c0_19] : memref<1x128xf32, #tpu.memory_space<vmem>>, vector<1x128xf32>
    tpu.vector_store %arg8[%c0_18, %c0_19], %147 {strides = array<i32>} : memref<1x128xf32, #tpu.memory_space<vmem>>, vector<1x128xf32>,
    return
  }
  func.func @transform_0(%arg0: i32) -> (i32, i32) {
    %c0_i32 = arith.constant 0 : i32
    %c0_i32_0 = arith.constant 0 : i32
    return %c0_i32, %arg0 : i32, i32
  }
  func.func @transform_1(%arg0: i32) -> (i32, i32) {
    %c0_i32 = arith.constant 0 : i32
    %c0_i32_0 = arith.constant 0 : i32
    %c0_i32_1 = arith.constant 0 : i32
    return %c0_i32, %c0_i32_0 : i32, i32
  }
  func.func @transform_2(%arg0: i32) -> (i32, i32) {
    %c0_i32 = arith.constant 0 : i32
    %c0_i32_0 = arith.constant 0 : i32
    %c0_i32_1 = arith.constant 0 : i32
    return %c0_i32, %c0_i32_0 : i32, i32
  }
  func.func @transform_3(%arg0: i32) -> (i32, i32) {
    %c0_i32 = arith.constant 0 : i32
    %c0_i32_0 = arith.constant 0 : i32
    %c0_i32_1 = arith.constant 0 : i32
    return %c0_i32, %c0_i32_0 : i32, i32
  }
  func.func @transform_4(%arg0: i32) -> (i32, i32) {
    %c0_i32 = arith.constant 0 : i32
    %c0_i32_0 = arith.constant 0 : i32
    %c0_i32_1 = arith.constant 0 : i32
    return %c0_i32, %c0_i32_0 : i32, i32
  }
  func.func @transform_5(%arg0: i32) -> (i32, i32) {
    %c0_i32 = arith.constant 0 : i32
    %c0_i32_0 = arith.constant 0 : i32
    %c0_i32_1 = arith.constant 0 : i32
    return %c0_i32, %c0_i32_0 : i32, i32
  }
  func.func @transform_6(%arg0: i32) -> (i32, i32) {
    %c0_i32 = arith.constant 0 : i32
    %c0_i32_0 = arith.constant 0 : i32
    %c0_i32_1 = arith.constant 0 : i32
    return %c0_i32, %c0_i32_0 : i32, i32
  }
  func.func @transform_7(%arg0: i32) -> (i32, i32) {
    %c0_i32 = arith.constant 0 : i32
    %c0_i32_0 = arith.constant 0 : i32
    return %c0_i32, %arg0 : i32, i32
  }
}

</mosaic_0001>

<bundles_post_ra>
// kernel: tpu_custom_call.1
= control target key start
LH: loop header
LB: loop body
LE: loop exit
PB: predicated region body
PF: predicated region fallthrough
CT: control target
= control target key end

     0   :  { %s1103_s0 = inlined_call_operand.vmem [shape: f32[2,384], index: 0, kind: input, shape index: {}]   ;;  %s1104_s1 = inlined_call_operand.vmem [shape: f32[10,2], index: 1, kind: input, shape index: {}]   ;;  %s1105_s2 = inlined_call_operand.vmem [shape: f32[10,1], index: 2, kind: input, shape index: {}]   ;;  %s1106_s3 = inlined_call_operand.vmem [shape: f32[10,10], index: 3, kind: input, shape index: {}]   ;;  %s1107_s4 = inlined_call_operand.vmem [shape: f32[10,1], index: 4, kind: input, shape index: {}]   ;;  %s1108_s5 = inlined_call_operand.vmem [shape: f32[1,10], index: 5, kind: input, shape index: {}]   ;;  %s1109_s6 = inlined_call_operand.<no memory space> [shape: f32[1,1], index: 6, kind: input, shape index: {}]   ;;  %s1110_s7 = inlined_call_operand.hbm [shape: f32[1,384], index: 7, kind: output, shape index: {}]  }
   0x1   :  { %v12_v0 = vstv %s1109_s6 }
   0x2   :  { %13 = vst [vmem:[#allocation2] sm:$0x1] %v12_v0 }
   0x3   :  { %14 = vsyncpa [#allocation4], 0 }
   0x4   :  { %16 = vsyncpa [#allocation4 + $0x1], 0  ;;  %s933_s26 = smov 0   ;;  %s935_s27 = smov 0  }
   0x5   :  { %s937_s28 = smov 0   ;;  %s939_s29 = smov 0  }
   0x6 LB: > { %s954_s6 = sadd.s32 4294967295, %s877_s29   ;;  %s719_s30 = sadd.s32 4294967294, %s877_s29   ;;  %s877_s29 = sphi %s939_s29, %s1116_s29   ;;  %s873_s28 = sphi %s937_s28, %s1115_s28   ;;  %s869_s27 = sphi %s935_s27, %s1114_s27   ;;  %s865_s26 = sphi %s933_s26, %s1113_s26  }
   0x7   : > { %s958_s8 = sadd.s32 1, %s877_s29   ;;  %s181_s9 = sadd.s32 1, %s873_s28 }
   0x8   : > { %s178_s10 = ssub.s32 %s877_s29, %s958_s8  ;;  %p191_p0 = scmp.ne.s32.totalorder %s873_s28, %s869_s27 }
   0x9   : > { %p179_p1 = scmp.eq.s32.totalorder %s178_s10, 0  ;;  %p192_p2 = scmp.eq.s32.totalorder %s954_s6, 2 }
   0xa   : > { %p197_p3 = scmp.ne.s32.totalorder %s869_s27, %s865_s26  ;;  %p198_p4 = scmp.eq.s32.totalorder %s719_s30, 2 }
   0xb   : > { %s969_s11 = scalar_select %p179_p1, %s873_s28, %s181_s9  }
   0xc   : > { %p971_p5 = por %p192_p2, %p191_p0  ;;  %p975_p6 = por %p198_p4, %p197_p3 }
   0xd   : > { %p722_p7 = scmp.ge.s32.totalorder %s877_s29, 1  ;;  %p241_p8 = scmp.lt.s32.totalorder %s877_s29, 4 }
   0xf   : > { %p242_p9 = pnand %p722_p7, %p241_p8 }
  0x10   : > { %v278_v1 = vld [vmem:[%s1105_s2] sm:$0xff] (!%p242_p9)  ;;  %v879_v3 = vmov (!%p242_p9), 1   ;;  %v880_v4 = vmov (!%p242_p9), 0   ;;  %v881_v6 = vmov (!%p242_p9), 2   ;;  %v882_v7 = vmov (!%p242_p9), 3   ;;  %p271_p10 = scmp.lt.s32.totalorder (!%p242_p9), %s954_s6, 2 }
  0x11   : > { %245 = sbr.rel (%p242_p9) target bundleno = 322 (0x142), region = 48  ;;  %v276_v2 = vld [vmem:[%s1104_s1] sm:$0xff] (!%p242_p9)  ;;  %776 = vset.pattern.permute.xlu0 (!%p242_p9), %v879_v3  ;;  %777 = vset.pattern.permute.xlu1 (!%p242_p9), %v880_v4  ;;  %v277_v8 = vld [vmem:[%s1104_s1 + $0x8] sm:$0x3] (!%p242_p9)  ;;  %v883_v9 = vmov (!%p242_p9), 8   ;;  %v884_v10 = vmov (!%p242_p9), 9   ;;  %v290_v30 = vlaneseq (!%p242_p9) }
  0x12   : > { %314 = vperm.xlu1 (!%p242_p9), %777, %v278_v1   ;;  %297 = vperm.xlu0 (!%p242_p9), %776, %v276_v2   ;;  %v326_v5 = vld [vmem:[%s1106_s3] sm:$0xff] (!%p242_p9)  ;;  %v885_v11 = vmov (!%p242_p9), 4   ;;  %v279_v12 = vld [vmem:[%s1105_s2 + $0x8] sm:$0x3] (!%p242_p9)  ;;  %v886_v14 = vmov (!%p242_p9), 6   ;;  %v887_v15 = vmov (!%p242_p9), 5  }
  0x13   : > { %v328_v13 = vld [vmem:[%s1107_s4] sm:$0xff] (!%p242_p9)  ;;  %v327_v16 = vld [vmem:[%s1106_s3 + $0x8] sm:$0x3] (!%p242_p9)  ;;  %v888_v17 = vmov (!%p242_p9), 7   ;;  %v291_v31 = vshrl.u32 (!%p242_p9), %v290_v30, 7  ;;  %s269_s22 = sand.u32 (!%p242_p9), 1, %s869_s27  }
  0x14   : > { %v504_v18 = vld [vmem:[%s1108_s5] sm:$0x1] (!%p242_p9)  ;;  %v329_v19 = vld [vmem:[%s1107_s4 + $0x8] sm:$0x3] (!%p242_p9)  ;;  %s724_s23 = sshll.u32 (!%p242_p9), %s954_s6, 4  ;;  %s270_s24 = scalar_lea.vmem (!%p242_p9), [#allocation3], %s269_s22 }
  0x15   : > { %v505_v20 = vld [vmem:[#allocation2] sm:$0x1] (!%p242_p9)  ;;  %v306_v34 = vsub.s32 (!%p242_p9), 1, %v291_v31  ;;  %v1038_v35 = vsub.s32 (!%p242_p9), 0, %v291_v31  ;;  %v372_v52 = vsub.s32 (!%p242_p9), 2, %v291_v31  ;;  %v388_v56 = vsub.s32 (!%p242_p9), 3, %v291_v31  ;;  %s1061_s10 = scalar_lea.hbm (!%p242_p9), %s1110_s7, %s724_s23 }
  0x16   : > { %332 = vperm.xlu1 (!%p242_p9), %777, %v326_v5   ;;  %779 = vset.pattern.permute.xlu0 (!%p242_p9), %v881_v6  ;;  %v404_v60 = vsub.s32 (!%p242_p9), 4, %v291_v31  ;;  %v420_v1 = vsub.s32 (!%p242_p9), 5, %v291_v31  ;;  %s664_s25 = sshll.u32 (!%p242_p9), %s270_s24, 4  ;;  %s652_s14 = scalar_lea.sflag (!%p242_p9), [#allocation4], %s269_s22  ;;  %s1063_s25 = int_to_ptr.vmem [resolvable:$true] %s664_s25 }
  0x17   : > { %363 = vperm.xlu0 (!%p242_p9), %779, %v326_v5   ;;  %s815_s15 = scalar_lea.vmem (!%p242_p9), %s1063_s25, 16 }
  0x18   : > { %s272_s17 = scalar_select %p271_p10, %s954_s6, 2 }
  0x19   : > { %p816_p11 = scmp.ne.s32.totalorder %s1063_s25, %s815_s15  ;;  %s889_s6 = smov [#allocation3]  }
  0x1a   : > { %778 = vset.pattern.permute.xlu1 %v879_v3  ;;  %s723_s18 = sshll.u32 %s272_s17, 1  ;;  %s819_s16 = sshll.u32 %s889_s6, 4  ;;  %s820_s16 = int_to_ptr.vmem [resolvable:$false] %s819_s16 }
  0x1b   : > { %347 = vperm.xlu1 %778, %v326_v5   ;;  %782 = vset.pattern.permute.xlu0 %v882_v7  ;;  %s274_s21 = scalar_lea.vmem %s1103_s0, %s723_s18  ;;  %p817_p12 = pnand %p816_p11, %p971_p5 }
  0x1c   : > { %379 = vperm.xlu0 %782, %v326_v5   ;;  %v275_v36 = vld [vmem:[%s274_s21] sm:$0x3]  ;;  %s821_s17 = scalar_lea.vmem %s820_s16, 32  ;;  %p822_p0 = scmp.lt.s32.totalorder %s1063_s25, %s820_s16 }
  0x1d   : > { %v307_v39 = vrot.slane %v275_v36, %v306_v34  ;;  %v293_v40 = vrot.slane %v275_v36, %v1038_v35  ;;  %p818_p13 = pneg %p817_p12  ;;  %p823_p1 = scmp.lt.s32.totalorder %s821_s17, %s815_s15 }
  0x1f   : > { %780 = vset.pattern.permute.xlu1 %v880_v4  ;;  %p824_p2 = por %p823_p1, %p822_p0 }
  0x20   : > { %287 = vperm.xlu1 %780, %v277_v8   ;;  %787 = vset.pattern.permute.xlu0 %v883_v9 }
  0x21   : > { %459 = vperm.xlu0 %787, %v326_v5   ;;  %p825_p3 = pnand %p824_p2, %p818_p13 }
  0x24   : > { %781 = vset.pattern.permute.xlu1 %v879_v3 }
  0x25   : > { %301 = vperm.xlu1 %781, %v277_v8   ;;  %790 = vset.pattern.permute.xlu0 %v884_v10  ;;  %v436_v8 = vsub.s32 6, %v291_v31 }
  0x26   : > { %475 = vperm.xlu0 %790, %v326_v5  }
  0x29   : > { %783 = vset.pattern.permute.xlu1 %v885_v11 }
  0x2a   : > { %395 = vperm.xlu1 %783, %v326_v5   ;;  %791 = vset.pattern.permute.xlu0 %v880_v4 }
  0x2b   : > { %282 = vperm.xlu0 %791, %v276_v2  }
  0x2e   : > { %784 = vset.pattern.permute.xlu1 %v880_v4 }
  0x2f   : > { %319 = vperm.xlu1 %784, %v279_v12   ;;  %492 = vperm.xlu0 %791, %v328_v13  }
  0x33   : > { %785 = vset.pattern.permute.xlu1 %v886_v14  ;;  %794 = vset.pattern.permute.xlu0 %v887_v15 }
  0x34   : > { %427 = vperm.xlu1 %785, %v326_v5   ;;  %411 = vperm.xlu0 %794, %v326_v5  }
  0x38   : > { %786 = vset.pattern.permute.xlu1 %v888_v17  ;;  %415 = vperm.xlu0 %794, %v327_v16  }
  0x39   : > { %443 = vperm.xlu1 %786, %v326_v5  }
  0x3c   : > { %799 = vset.pattern.permute.xlu0 %v886_v14 }
  0x3d   : > { %788 = vset.pattern.permute.xlu1 %v880_v4  ;;  %431 = vperm.xlu0 %799, %v327_v16  }
  0x3e   : > { %337 = vperm.xlu1 %788, %v327_v16  }
  0x41   : > { %802 = vset.pattern.permute.xlu0 %v885_v11 }
  0x42   : > { %789 = vset.pattern.permute.xlu1 %v879_v3  ;;  %556 = vperm.xlu0 %802, %v504_v18  }
  0x43   : > { %351 = vperm.xlu1 %789, %v327_v16  }
  0x46   : > { %805 = vset.pattern.permute.xlu0 %v884_v10 }
  0x47   : > { %792 = vset.pattern.permute.xlu1 %v881_v6  ;;  %479 = vperm.xlu0 %805, %v327_v16  }
  0x48   : > { %367 = vperm.xlu1 %792, %v327_v16  }
  0x4b   : > { %808 = vset.pattern.permute.xlu0 %v880_v4 }
  0x4c   : > { %793 = vset.pattern.permute.xlu1 %v882_v7  ;;  %497 = vperm.xlu0 %808, %v329_v19   ;;  %v452_v19 = vsub.s32 7, %v291_v31 }
  0x4d   : > { %383 = vperm.xlu1 %793, %v327_v16  }
  0x50   : > { %632 = vperm.xlu0 %808, %v505_v20  }
  0x51   : > { %795 = vset.pattern.permute.xlu1 %v885_v11 }
  0x52   : > { %399 = vperm.xlu1 %795, %v327_v16  }
  0x56   : > { %796 = vset.pattern.permute.xlu1 %v879_v3 }
  0x57   : > { %517 = vperm.xlu1 %796, %v504_v18  }
  0x5b   : > { %797 = vset.pattern.permute.xlu1 %v880_v4 }
  0x5c   : > { %508 = vperm.xlu1 %797, %v504_v18  }
  0x60   : > { %798 = vset.pattern.permute.xlu1 %v881_v6 }
  0x61   : > { %530 = vperm.xlu1 %798, %v504_v18  }
  0x65   : > { %800 = vset.pattern.permute.xlu1 %v882_v7 }
  0x66   : > { %543 = vperm.xlu1 %800, %v504_v18  }
  0x6a   : > { %801 = vset.pattern.permute.xlu1 %v888_v17 }
  0x6b   : > { %447 = vperm.xlu1 %801, %v327_v16  }
  0x6f   : > { %803 = vset.pattern.permute.xlu1 %v883_v9 }
  0x70   : > { %463 = vperm.xlu1 %803, %v327_v16  }
  0x74   : > { %804 = vset.pattern.permute.xlu1 %v887_v15 }
  0x75   : > { %569 = vperm.xlu1 %804, %v504_v18  }
  0x79   : > { %806 = vset.pattern.permute.xlu1 %v886_v14 }
  0x7a   : > { %582 = vperm.xlu1 %806, %v504_v18  }
  0x7e   : > { %807 = vset.pattern.permute.xlu1 %v888_v17 }
  0x7f   : > { %595 = vperm.xlu1 %807, %v504_v18  }
  0x83   : > { %809 = vset.pattern.permute.xlu1 %v883_v9 }
  0x84   : > { %608 = vperm.xlu1 %809, %v504_v18  }
  0x88   : > { %810 = vset.pattern.permute.xlu1 %v884_v10 }
  0x89   : > { %618 = vperm.xlu1 %810, %v504_v18  }
  0x91   : > { %v315_v21 = vpop.permute.xlu1 %314  ;;  %v298_v22 = vpop.permute.xlu0 %297 }
  0x92   : > { %v308_v41 = vmul.f32 %v307_v39, %v298_v22 }
  0x95   : > { %v333_v23 = vpop.permute.xlu1 %332 }
  0x96   : > { %v364_v24 = vpop.permute.xlu0 %363 }
  0x9a   : > { %v348_v25 = vpop.permute.xlu1 %347 }
  0x9b   : > { %v380_v26 = vpop.permute.xlu0 %379 }
  0x9f   : > { %v288_v27 = vpop.permute.xlu1 %287 }
  0xa0   : > { %v1031_v28 = vpop.permute.xlu0 %459  ;;  %v295_v7 = vmul.f32 %v293_v40, %v288_v27 }
  0xa4   : > { %v302_v29 = vpop.permute.xlu1 %301 }
  0xa5   : > { %v1033_v33 = vpop.permute.xlu0 %475  ;;  %v309_v5 = vmul.f32 %v307_v39, %v302_v29 }
  0xa7   : > { %v311_v13 = vadd.f32 %v309_v5, %v295_v7 }
  0xa9   : > { %v396_v32 = vpop.permute.xlu1 %395 }
  0xaa   : > { %v283_v38 = vpop.permute.xlu0 %282 }
  0xab   : > { %v294_v42 = vmul.f32 %v293_v40, %v283_v38 }
  0xad   : > { %v310_v44 = vadd.f32 %v308_v41, %v294_v42 }
  0xae   : > { %v320_v37 = vpop.permute.xlu1 %319  ;;  %v493_v0 = vpop.permute.xlu0 %492 }
  0xaf   : > { %v322_v46 = vadd.f32 %v315_v21, %v310_v44  ;;  %v323_v15 = vadd.f32 %v320_v37, %v311_v13 }
  0xb1   : > { %v324_v48 = vmax.f32 %v322_v46, 0.0  ;;  %v325_v21 = vmax.f32 %v323_v15, 0.0 }
  0xb3   : > { %v428_v43 = vpop.permute.xlu1 %427  ;;  %v343_v50 = vrot.slane %v324_v48, %v1038_v35  ;;  %v357_v51 = vrot.slane %v324_v48, %v306_v34  ;;  %v373_v57 = vrot.slane %v324_v48, %v372_v52  ;;  %v389_v62 = vrot.slane %v324_v48, %v388_v56  ;;  %v412_v11 = vpop.permute.xlu0 %411 }
  0xb4   : > { %v405_v3 = vrot.slane %v324_v48, %v404_v60  ;;  %v421_v10 = vrot.slane %v324_v48, %v420_v1  ;;  %v437_v16 = vrot.slane %v324_v48, %v436_v8 }
  0xb5   : > { %v344_v53 = vmul.f32 %v343_v50, %v333_v23  ;;  %v358_v54 = vmul.f32 %v357_v51, %v348_v25  ;;  %v374_v61 = vmul.f32 %v373_v57, %v364_v24  ;;  %v390_v2 = vmul.f32 %v389_v62, %v380_v26 }
  0xb6   : > { %v406_v9 = vmul.f32 %v405_v3, %v396_v32  ;;  %v422_v17 = vmul.f32 %v421_v10, %v412_v11  ;;  %v438_v22 = vmul.f32 %v437_v16, %v428_v43  ;;  %v453_v24 = vrot.slane %v324_v48, %v452_v19 }
  0xb7   : > { %v360_v58 = vadd.f32 %v358_v54, %v344_v53  ;;  %v469_v26 = vrot.slane %v325_v21, %v1038_v35  ;;  %v485_v32 = vrot.slane %v325_v21, %v306_v34  ;;  %v416_v43 = vpop.permute.xlu0 %415 }
  0xb8   : > { %v444_v45 = vpop.permute.xlu1 %443  ;;  %v423_v34 = vmul.f32 %v421_v10, %v416_v43 }
  0xb9   : > { %v376_v63 = vadd.f32 %v374_v61, %v360_v58  ;;  %v454_v27 = vmul.f32 %v453_v24, %v444_v45  ;;  %v470_v30 = vmul.f32 %v469_v26, %v1031_v28  ;;  %v486_v31 = vmul.f32 %v485_v32, %v1033_v33 }
  0xbb   : > { %v392_v6 = vadd.f32 %v390_v2, %v376_v63 }
  0xbc   : > { %v432_v28 = vpop.permute.xlu0 %431 }
  0xbd   : > { %v338_v47 = vpop.permute.xlu1 %337  ;;  %v408_v14 = vadd.f32 %v406_v9, %v392_v6 }
  0xbe   : > { %v345_v39 = vmul.f32 %v343_v50, %v338_v47 }
  0xbf   : > { %v424_v18 = vadd.f32 %v422_v17, %v408_v14 }
  0xc1   : > { %v440_v23 = vadd.f32 %v438_v22, %v424_v18 }
  0xc2   : > { %v352_v49 = vpop.permute.xlu1 %351 }
  0xc3   : > { %v456_v29 = vadd.f32 %v454_v27, %v440_v23  ;;  %v359_v36 = vmul.f32 %v357_v51, %v352_v49 }
  0xc5   : > { %v472_v37 = vadd.f32 %v470_v30, %v456_v29  ;;  %v361_v41 = vadd.f32 %v359_v36, %v345_v39 }
  0xc7   : > { %v368_v55 = vpop.permute.xlu1 %367  ;;  %v488_v46 = vadd.f32 %v486_v31, %v472_v37 }
  0xc8   : > { %v375_v40 = vmul.f32 %v373_v57, %v368_v55  ;;  %v557_v57 = vpop.permute.xlu0 %556 }
  0xc9   : > { %v500_v45 = vadd.f32 %v493_v0, %v488_v46 }
  0xca   : > { %v377_v48 = vadd.f32 %v375_v40, %v361_v41 }
  0xcb   : > { %v502_v50 = vmax.f32 %v500_v45, 0.0 }
  0xcc   : > { %v384_v59 = vpop.permute.xlu1 %383  ;;  %v480_v9 = vpop.permute.xlu0 %479 }
  0xcd   : > { %v391_v42 = vmul.f32 %v389_v62, %v384_v59  ;;  %v439_v59 = vmul.f32 %v437_v16, %v432_v28  ;;  %v487_v15 = vmul.f32 %v485_v32, %v480_v9 }
  0xcf   : > { %v393_v53 = vadd.f32 %v391_v42, %v377_v48 }
  0xd0   : > { %v498_v23 = vpop.permute.xlu0 %497 }
  0xd1   : > { %v400_v4 = vpop.permute.xlu1 %399 }
  0xd2   : > { %v407_v52 = vmul.f32 %v405_v3, %v400_v4  ;;  %v562_v3 = vrot.slane %v557_v57, %v1038_v35 }
  0xd4   : > { %v409_v54 = vadd.f32 %v407_v52, %v393_v53  ;;  %v563_v14 = vmul.f32 %v562_v3, %v502_v50  ;;  %v633_v46 = vpop.permute.xlu0 %632 }
  0xd5   : > { %v638_v53 = vrot.slane %v633_v46, %v1038_v35 }
  0xd6   : > { %v518_v12 = vpop.permute.xlu1 %517  ;;  %v425_v51 = vadd.f32 %v423_v34, %v409_v54 }
  0xd7   : > { %v523_v49 = vrot.slane %v518_v12, %v1038_v35 }
  0xd8   : > { %v441_v1 = vadd.f32 %v439_v59, %v425_v51 }
  0xd9   : > { %v524_v60 = vmul.f32 %v523_v49, %v502_v50 }
  0xdb   : > { %v509_v20 = vpop.permute.xlu1 %508  ;;  %v526_v4 = vrot.slane %v524_v60, 1 }
  0xdc   : > { %v514_v33 = vrot.slane %v509_v20, %v1038_v35 }
  0xde   : > { %v515_v63 = vmul.f32 %v514_v33, %v502_v50 }
  0xe0   : > { %v531_v25 = vpop.permute.xlu1 %530  ;;  %v528_v10 = vadd.f32 %v526_v4, %v515_v63 }
  0xe1   : > { %v536_v47 = vrot.slane %v531_v25, %v1038_v35 }
  0xe3   : > { %v537_v61 = vmul.f32 %v536_v47, %v502_v50 }
  0xe5   : > { %v544_v38 = vpop.permute.xlu1 %543  ;;  %v539_v5 = vrot.slane %v537_v61, 2 }
  0xe6   : > { %v549_v55 = vrot.slane %v544_v38, %v1038_v35 }
  0xe7   : > { %v541_v16 = vadd.f32 %v539_v5, %v528_v10 }
  0xe8   : > { %v550_v0 = vmul.f32 %v549_v55, %v502_v50 }
  0xea   : > { %v448_v44 = vpop.permute.xlu1 %447  ;;  %v552_v11 = vrot.slane %v550_v0, 3 }
  0xeb   : > { %v455_v62 = vmul.f32 %v453_v24, %v448_v44  ;;  %v565_v24 = vrot.slane %v563_v14, 4 }
  0xec   : > { %v554_v19 = vadd.f32 %v552_v11, %v541_v16 }
  0xed   : > { %v457_v6 = vadd.f32 %v455_v62, %v441_v1 }
  0xee   : > { %v567_v27 = vadd.f32 %v565_v24, %v554_v19 }
  0xef   : > { %v464_v56 = vpop.permute.xlu1 %463 }
  0xf0   : > { %v471_v2 = vmul.f32 %v469_v26, %v464_v56 }
  0xf2   : > { %v473_v12 = vadd.f32 %v471_v2, %v457_v6 }
  0xf4   : > { %v570_v58 = vpop.permute.xlu1 %569  ;;  %v489_v20 = vadd.f32 %v487_v15, %v473_v12 }
  0xf5   : > { %v575_v7 = vrot.slane %v570_v58, %v1038_v35 }
  0xf6   : > { %v501_v29 = vadd.f32 %v498_v23, %v489_v20 }
  0xf7   : > { %v576_v17 = vmul.f32 %v575_v7, %v502_v50 }
  0xf8   : > { %v503_v39 = vmax.f32 %v501_v29, 0.0 }
  0xf9   : > { %v583_v8 = vpop.permute.xlu1 %582  ;;  %v578_v25 = vrot.slane %v576_v17, 5 }
  0xfa   : > { %v588_v13 = vrot.slane %v583_v8, %v1038_v35 }
  0xfb   : > { %v580_v38 = vadd.f32 %v578_v25, %v567_v27 }
  0xfc   : > { %v589_v21 = vmul.f32 %v588_v13, %v502_v50 }
  0xfe   : > { %v596_v18 = vpop.permute.xlu1 %595  ;;  %v591_v30 = vrot.slane %v589_v21, 6 }
  0xff   : > { %v601_v22 = vrot.slane %v596_v18, %v1038_v35 }
 0x100   : > { %v593_v40 = vadd.f32 %v591_v30, %v580_v38 }
 0x101   : > { %v602_v26 = vmul.f32 %v601_v22, %v502_v50 }
 0x103   : > { %v609_v36 = vpop.permute.xlu1 %608  ;;  %v604_v37 = vrot.slane %v602_v26, 7 }
 0x104   : > { %v614_v32 = vrot.slane %v609_v36, %v1038_v35 }
 0x105   : > { %v606_v41 = vadd.f32 %v604_v37, %v593_v40 }
 0x106   : > { %v615_v42 = vmul.f32 %v614_v32, %v503_v39 }
 0x108   : > { %v619_v31 = vpop.permute.xlu1 %618  ;;  %v616_v48 = vadd.f32 %v615_v42, %v606_v41 }
 0x109   : > { %v624_v43 = vrot.slane %v619_v31, %v1038_v35 }
 0x10b   : > { %v625_v44 = vmul.f32 %v624_v43, %v503_v39 }
 0x10d   : > { %v627_v52 = vrot.slane %v625_v44, 1 }
 0x10f   : > { %v629_v45 = vadd.f32 %v627_v52, %v616_v48 }
 0x111   : > { %v639_v54 = vadd.f32 %v638_v53, %v629_v45 }
 0x113   : > { %v640_v56 = vand.u32 2147483647, %v639_v54  ;;  %vm647_vm0 = vcmp.ge.f32.partialorder %v639_v54, 0.0 }
 0x115   : > { %v641_v28 = vsub.f32 0.0, %v640_v56 }
 0x117   : > { %v642_v34 = vmul.f32 1.442695, %v641_v28 }
 0x119   : > { %811 = vpow2.f32 %v642_v34 }
 0x123   : > { %v812_v49 = vpop.eup %811 }
 0x124   : > { %v644_v47 = vadd.f32 1.0, %v812_v49 }
 0x126   : > { %813 = vrcp.f32 %v644_v47 }
 0x130   : > { %v814_v50 = vpop.eup %813 }
 0x131   : > { %v648_v51 = vmul.f32 %v814_v50, %v812_v49 }
 0x133   : > { %v649_v35 = vsel %vm647_vm0, %v814_v50, %v648_v51 }
 0x134   : > { %650 = vst [vmem:[%s270_s24] sm:$0x1] %v649_v35 }
 0x135   : > { %828 = shalt.err (!%p825_p3)
}
 0x136   : > { %s829_s18 = scalar_lea.hbm %s1061_s10, 16  ;;  %s833_s21 = scalar_lea.hbm %s1110_s7, 48 }
 0x137   : > { %p830_p4 = scmp.ne.s32.totalorder %s1061_s10, %s829_s18  ;;  %p834_p9 = scmp.lt.u32.totalorder %s1061_s10, %s1110_s7 }
 0x138   : > { %p835_p10 = scmp.lt.u32.totalorder %s833_s21, %s829_s18  ;;  %p837_p12 = scmp.lt.u32.totalorder %s829_s18, %s1061_s10 }
 0x139   : > { %p831_p7 = pnand %p830_p4, %p971_p5 }
 0x13a   : > { %p836_p11 = por %p835_p10, %p834_p9 }
 0x13b   : > { %p832_p8 = pneg %p831_p7 }
 0x13c   : > { %p838_p13 = por %p837_p12, %p836_p11 }
 0x13e   : > { %p839_p0 = pnand %p838_p13, %p832_p8 }
 0x140   : > { %842 = shalt.err (!%p839_p0)
}
 0x141   : > { %727 = dma.vmem_to_hbm [thread:$0]  (%p971_p5), %s1063_s25, 16, %s1061_s10, %s652_s14  }
 0x142 PF: > { %p733_p1 = scmp.ge.s32.totalorder %s877_s29, 2  ;;  %s676_s24 = sand.u32 1, %s865_s26  }
 0x143   : > { %s677_s30 = scalar_lea.sflag [#allocation4], %s676_s24 }
 0x144   : > { %p730_p2 = pnand %p733_p1, %p975_p6 }
 0x146   : > { %860 = dma.done.wait (!%p730_p2), %s677_s30, 16  }
 0x147   : > { %862 = vsyncadd (!%p730_p2), %s677_s30, 4294967280  ;;  %p19_p3 = scmp.ge.s32.totalorder %s958_s8, 5   ;;  %s1113_s26 = smov %s869_s27 }
 0x148   : > { %s1114_s27 = smov %s873_s28  ;;  %s1115_s28 = smov %s969_s11 }
 0x149   : > { %s1116_s29 = smov %s958_s8  ;;  %21 = sbr.rel (!%p19_p3) target bundleno = 6 (0x6), region = 83 }
 0x150   :  { %681 = vsyncpa [#allocation4], 1 }
 0x151   :  { %683 = vsyncpa [#allocation4 + $0x1], 1 }

</bundles_post_ra>
